<compile_context>
chip_gen: v7x
topology: tpu7x:2x2x1
jax: 0.10.0
libtpu: 0.0.40
codegen_flags: <defaults>
</compile_context>

<pallas_src>
import functools
import math

import jax
import jax.numpy as jnp
from jax.experimental import pallas as pl
from jax.experimental.pallas import tpu as pltpu


def _build_pe(d_model: int, max_len: int = 5000, dtype=jnp.float32) -> jnp.ndarray:
    """Sinusoidal table matching the torch buffer: shape (max_len, 1, d_model)."""
    position = jnp.arange(0, max_len, dtype=jnp.float32)[:, None]                # (L, 1)
    div_term = jnp.exp(
        jnp.arange(0, d_model, 2, dtype=jnp.float32) * -(math.log(10000.0) / d_model)
    )                                                                             # (ceil(D/2),)
    angles = position * div_term                                                  # (L, ceil(D/2))
    pe = jnp.zeros((max_len, d_model), dtype=jnp.float32)
    pe = pe.at[:, 0::2].set(jnp.sin(angles))
    pe = pe.at[:, 1::2].set(jnp.cos(angles[:, : d_model // 2]))
    return pe[:, None, :].astype(dtype)                                           # (L, 1, D)


def _add_pe_kernel(x_ref, pe_ref, o_ref, *, batch: int):
    # x_ref: (tS, B*D), pe_ref: (tS, D).
    x = x_ref[...]
    pe = jnp.tile(pe_ref[...], (1, batch))            # replicate over batch along lanes
    # Compute the add in f32 (matches torch's f32 buffer precision), store as x.dtype.
    o_ref[...] = (x.astype(jnp.float32) + pe.astype(jnp.float32)).astype(o_ref.dtype)


def _choose_seq_tile(S: int, row_bytes: int, target_bytes: int = 8 << 20,
                     min_tiles: int = 4) -> int:
    """Sequence-tile size: ~target_bytes per x block, sublane dim a multiple of 8
    (or the full S), and at least `min_tiles` grid steps when S is long enough
    (keeps both v7x TensorCores busy)."""
    rows = max(8, target_bytes // max(1, row_bytes))
    cap = -(-S // min_tiles)                 # cdiv(S, min_tiles)
    if cap >= 8:
        rows = min(rows, cap)
    rows = min(rows, S)
    if rows < S:
        rows = max(8, (rows // 8) * 8)       # (8,128) rule: sublane dim multiple of 8
    return int(rows)


def positional_encoding_forward(x: jnp.ndarray, pe: jnp.ndarray, *,
                                donate_x: bool = False) -> jnp.ndarray:
    """x: (S, B, D); pe: full buffer (max_len, 1, D). Returns x + pe[:S]."""
    S, B, D = x.shape
    L = pe.shape[0]
    assert S <= L, f"sequence length {S} exceeds positional table length {L}"
    assert pe.shape == (L, 1, D), f"pe shape {pe.shape} incompatible with x {x.shape}"

    x_itemsize = jnp.dtype(x.dtype).itemsize
    pe_itemsize = jnp.dtype(pe.dtype).itemsize

    # Free, contiguous reshapes: present lane-dense 2-D slabs to the kernel.
    x2 = x.reshape(S, B * D)
    pe2 = pe.reshape(L, D)

    tS = _choose_seq_tile(S, B * D * x_itemsize)

    # VMEM footprint: double-buffered x in + out blocks + pe block, plus margin.
    x_blk = tS * B * D * x_itemsize
    pe_blk = tS * D * pe_itemsize
    vmem_limit = int(2 * (2 * x_blk + pe_blk) * 1.25) + (2 << 20)
    vmem_limit = min(max(vmem_limit, 4 << 20), 64 << 20)

    cost = pl.CostEstimate(
        flops=S * B * D,
        transcendentals=0,
        bytes_accessed=2 * S * B * D * x_itemsize + S * D * pe_itemsize,
    )

    out2 = pl.pallas_call(
        functools.partial(_add_pe_kernel, batch=B),
        out_shape=jax.ShapeDtypeStruct((S, B * D), x.dtype),
        grid=(pl.cdiv(S, tS),),
        in_specs=[
            pl.BlockSpec((tS, B * D), lambda i: (i, 0)),
            # full pe buffer passed un-sliced; only rows covering [0, S) are DMA'd
            pl.BlockSpec((tS, D), lambda i: (i, 0)),
        ],
        out_specs=pl.BlockSpec((tS, B * D), lambda i: (i, 0)),
        compiler_params=pltpu.CompilerParams(
            dimension_semantics=("parallel",),   # v7x: shard S-tiles across both TCs
            vmem_limit_bytes=vmem_limit,         # computed, generation-safe
        ),
        cost_estimate=cost,
        input_output_aliases={0: 0} if donate_x else {},
    )(x2, pe2)

    return out2.reshape(S, B, D)


if __name__ == "__main__":
    d_model = 32
    seq_len = 8
    batch = 2
    max_len = 5000

    # Table built once, in the target dtype (no per-call cast of the full table).
    pe = _build_pe(d_model, max_len)                       # (5000, 1, 32) f32

    key = jax.random.PRNGKey(0)
    x = jax.random.normal(key, (seq_len, batch, d_model), dtype=jnp.float32)

    out = jax.block_until_ready(positional_encoding_forward(x, pe))

    # correctness check against plain-JAX reference (same math as torch forward)
    ref = x + pe[:seq_len]
    assert out.shape == (seq_len, batch, d_model)
    assert jnp.allclose(out, ref, atol=1e-6), "mismatch vs reference"

    print("KERNEL_OK")
</pallas_src>

<mosaic_0001>
module attributes {stable_mosaic.version = 11 : i64} {
  func.func @_add_pe_kernel(%arg0: i32, %arg1: memref<8x64xf32, #tpu.memory_space<vmem>>, %arg2: memref<8x32xf32, #tpu.memory_space<vmem>>, %arg3: memref<8x64xf32, #tpu.memory_space<vmem>>) attributes {dimension_semantics = [#tpu.dimension_semantics<parallel>], iteration_bounds = array<i64: 1>, scalar_prefetch = 0 : i64, scratch_operands = 0 : i64, tpu.core_type = #tpu.core_type<tc>, window_params = [{transform_indices = @transform_0, window_bounds = array<i64: 8, 64>}, {transform_indices = @transform_1, window_bounds = array<i64: 8, 32>}, {transform_indices = @transform_2, window_bounds = array<i64: 8, 64>}]} {
    %c0 = arith.constant 0 : index
    %c0_0 = arith.constant 0 : index
    %0 = vector.load %arg1[%c0, %c0_0] : memref<8x64xf32, #tpu.memory_space<vmem>>, vector<8x64xf32>
    %c0_1 = arith.constant 0 : index
    %c0_2 = arith.constant 0 : index
    %1 = vector.load %arg2[%c0_1, %c0_2] : memref<8x32xf32, #tpu.memory_space<vmem>>, vector<8x32xf32>
    %2 = tpu.concatenate %1, %1 in 1 : vector<8x32xf32>, vector<8x32xf32> -> vector<8x64xf32>
    %3 = arith.addf %0, %2 : vector<8x64xf32>
    %c0_3 = arith.constant 0 : index
    %c0_4 = arith.constant 0 : index
    %4 = vector.load %arg3[%c0_3, %c0_4] : memref<8x64xf32, #tpu.memory_space<vmem>>, vector<8x64xf32>
    tpu.vector_store %arg3[%c0_3, %c0_4], %3 {strides = array<i32>} : memref<8x64xf32, #tpu.memory_space<vmem>>, vector<8x64xf32>,
    return
  }
  func.func @transform_0(%arg0: i32) -> (i32, i32) {
    %c0_i32 = arith.constant 0 : i32
    %c0_i32_0 = arith.constant 0 : i32
    return %arg0, %c0_i32 : i32, i32
  }
  func.func @transform_1(%arg0: i32) -> (i32, i32) {
    %c0_i32 = arith.constant 0 : i32
    %c0_i32_0 = arith.constant 0 : i32
    return %arg0, %c0_i32 : i32, i32
  }
  func.func @transform_2(%arg0: i32) -> (i32, i32) {
    %c0_i32 = arith.constant 0 : i32
    %c0_i32_0 = arith.constant 0 : i32
    return %arg0, %c0_i32 : i32, i32
  }
}

</mosaic_0001>

<bundles_post_ra>
// kernel: tpu_custom_call.1
= control target key start
LH: loop header
LB: loop body
LE: loop exit
PB: predicated region body
PF: predicated region fallthrough
CT: control target
= control target key end

     0   :  { %s98_s0 = inlined_call_operand.vmem [shape: f32[8,64], index: 0, kind: input, shape index: {}]   ;;  %s99_s1 = inlined_call_operand.vmem [shape: f32[5000,32], index: 1, kind: input, shape index: {}]   ;;  %s100_s2 = inlined_call_operand.hbm [shape: f32[8,64], index: 2, kind: output, shape index: {}]  }
   0x1   :  { %v13_v0 = vld [vmem:[%s99_s1] sm:$0xff] }
   0x2   :  { %7 = vsyncpa [#allocation3], 0  ;;  %s63_s11 = smov 32   ;;  %vm18_vm0 = vcmask 261120   ;;  %v12_v1 = vld [vmem:[%s98_s0] sm:$0xff]  ;;  %s64_s14 = smov [#allocation2]  }
   0x3   :  { %15 = vrot.lane.b32.xlu0 %v13_v0, %s63_s11  ;;  %s29_s15 = sshll.u32 %s64_s14, 4  ;;  %vm21_vm1 = vcmask 523264   ;;  %s30_s15 = int_to_ptr.vmem [resolvable:$true] %s29_s15 }
   0x4   :  { %s39_s16 = scalar_lea.vmem %s30_s15, 128  ;;  %p44_p1 = scmp.lt.s32.totalorder %s30_s15, %s30_s15 }
   0x5   :  { %p40_p0 = scmp.ne.s32.totalorder %s30_s15, %s39_s16  ;;  %p45_p2 = scmp.lt.s32.totalorder %s39_s16, %s39_s16 }
   0x7   :  { %p46_p3 = por %p45_p2, %p44_p1 }
   0x9   :  { %p47_p4 = pnand %p46_p3, %p40_p0 }
  0x75   :  { %v16_v2 = vpop.permute.xlu0 %15 }
  0x76   :  { %v19_v3 = vsel %vm18_vm0, %v13_v0, %v16_v2 }
  0x77   :  { %v20_v4 = vadd.f32 %v19_v3, %v12_v1 }
  0x79   :  { %22 = vst.msk [vmem:[#allocation2] sm:$0xff] %vm21_vm1, %v20_v4 }
  0x7a   :  { %50 = shalt.err (!%p47_p4)
}
  0x7b   :  { %s51_s18 = scalar_lea.hbm %s100_s2, 128 }
  0x7c   :  { %p52_p5 = scmp.ne.s32.totalorder %s100_s2, %s51_s18  ;;  %p55_p6 = scmp.lt.u32.totalorder %s51_s18, %s100_s2 }
  0x7e   :  { %p57_p7 = pnand %p55_p6, %p52_p5 }
  0x80   :  { %60 = shalt.err (!%p57_p7)
}
  0x81   :  { %32 = dma.vmem_to_hbm [thread:$0]  %s30_s15, 128, %s100_s2, [#allocation3]  }
  0x82   :  { %61 = dma.done.wait [#allocation3], 128  }
  0x83   :  { %62 = vsyncadd [#allocation3], 4294967168 }
  0x84   :  { %36 = vsyncpa [#allocation3], 1 }

</bundles_post_ra>
